<compile_context>
chip_gen: v7x
topology: tpu7x:2x2x1
jax: 0.10.0
libtpu: 0.0.40
codegen_flags: <defaults>
</compile_context>

<pallas_src>
import jax
import jax.numpy as jnp
from jax.experimental import pallas as pl
from jax.experimental.pallas import tpu as pltpu


def _cdiv(a, b):
    return -(-a // b)


def _round_up(a, b):
    return _cdiv(a, b) * b


def _make_vpu_kernel(C: int, H: int):
    """Unrolled VPU multiply-add path for tiny contraction depth (C <= 8)."""

    def kernel(x_ref, w_ref, b_ref, o_ref):
        # x_ref: (TB, C, TL)   w_ref: (H, C)   b_ref: (H, 1)   o_ref: (TB, H, TL)
        tb = x_ref.shape[0]
        tl = x_ref.shape[-1]
        # Hoist every loop-invariant broadcast / slice out of the batch loop:
        # JAX does not CSE broadcast_in_dim, so re-emitting these per batch row
        # would burn O(TB*C) redundant VALU/XLU work and vregs.
        w_f32 = w_ref[...].astype(jnp.float32)            # (H, C)
        w_cols = [w_f32[:, c:c + 1] for c in range(C)]    # C x (H, 1)
        b_f32 = jnp.broadcast_to(b_ref[...].astype(jnp.float32), (H, tl))
        # TB is capped at 8, so this static unroll stays small (<= 8*C FMAs).
        for bb in range(tb):
            xb = x_ref[bb].astype(jnp.float32)             # (C, TL)
            acc = b_f32
            for c in range(C):
                acc = acc + w_cols[c] * xb[c:c + 1, :]
            o_ref[bb] = acc.astype(o_ref.dtype)

    return kernel


def _mxu_kernel(x_ref, w_ref, b_ref, o_ref):
    """One wide (H, C) x (C, TL) MXU dot per grid step (batch block is size 1)."""
    # x_ref: (1, C, TL)   w_ref: (H, C)   b_ref: (H, 1)   o_ref: (1, H, TL)
    acc = jnp.dot(w_ref[...], x_ref[0], preferred_element_type=jnp.float32)
    o_ref[0] = (acc + b_ref[...].astype(jnp.float32)).astype(o_ref.dtype)


def _vmem_budget_bytes():
    """Generation-aware budget for the double-buffered tiles + scoped limit."""
    phys = 64 * 1024 * 1024  # conservative fallback (v7x-class physical VMEM)
    try:
        info = pltpu.get_tpu_info()
        cap = getattr(info, "vmem_capacity_bytes", None)
        if cap:
            phys = int(cap)
    except Exception:
        pass
    if phys <= 64 * 1024 * 1024:          # v7x-class
        budget = 24 * 1024 * 1024
    else:                                  # v5e / v6e (128 MiB physical)
        budget = 48 * 1024 * 1024
    # Scoped VMEM limit: tiles + headroom for Mosaic's own scratch, but never
    # more than ~3/4 of physical VMEM.  (v5e's default scoped limit is only
    # 16 MiB, so setting this explicitly is required for the bigger tiles.)
    limit = min(budget + 16 * 1024 * 1024, (phys * 3) // 4)
    return budget, limit


def _choose_tiles(B, C, L, H, x_itemsize, w_itemsize, budget, allow_tb):
    param_bytes = (H * C + H) * w_itemsize

    def step_bytes(tb, tl):
        # Both the x tile and the out tile are double-buffered by the pipeline.
        return 2 * tb * (C + H) * tl * x_itemsize + param_bytes

    # Lane tile: full L if it fits (block == full dim is always legal even when
    # L is not a multiple of 128); otherwise the largest lane-dense multiple of
    # 128 (capped at 2048) that fits the budget.  TL = L < 128 gives masked
    # stores, but such problems are launch-bound anyway.
    if step_bytes(1, L) <= budget:
        TL = L
    else:
        TL = min(128, L)
        for cand in (2048, 1024, 512, 256, 128):
            if cand <= L and step_bytes(1, cand) <= budget:
                TL = cand
                break

    # Batch tile: largest divisor of B (capped at 8) that still fits.  The MXU
    # path always uses TB = 1 so each step issues a single wide dot.
    TB = 1
    if allow_tb:
        for cand in range(min(B, 8), 0, -1):
            if B % cand == 0 and step_bytes(cand, TL) <= budget:
                TB = cand
                break

    # Guarantee >= 2 grid steps when a meaningful amount of data moves, so both
    # of v7x's TensorCores get work ("parallel" axes shard grid steps).
    total_bytes = B * (C + H) * L * x_itemsize
    if total_bytes > (512 << 10) and (B // TB) * _cdiv(L, TL) < 2:
        if L >= 256:
            TL = _round_up(_cdiv(L, 2), 128)
        elif TB > 1:
            for cand in range(TB // 2, 0, -1):
                if B % cand == 0:
                    TB = cand
                    break
    return TB, TL


def encoder_forward(x, weight, bias):
    """Conv1d(kernel_size=1) forward pass.

    x:      (B, C, L)  -- NCL layout, same as PyTorch nn.Conv1d input
    weight: (H, C)     -- PyTorch conv.weight[:, :, 0]
    bias:   (H,)
    returns (B, H, L) in x.dtype
    """
    B, C, L = x.shape
    H = weight.shape[0]
    bias2d = bias.reshape(H, 1)

    budget, vmem_limit = _vmem_budget_bytes()
    # Tiny contraction depth -> unrolled f32 VPU FMA (a K=C<=8 MXU pass is
    # nearly empty; the op is HBM-bandwidth bound).  Larger C -> one wide MXU
    # dot per grid step.
    use_vpu = C <= 8
    TB, TL = _choose_tiles(B, C, L, H, x.dtype.itemsize, weight.dtype.itemsize,
                           budget, allow_tb=use_vpu)

    kernel = _make_vpu_kernel(C, H) if use_vpu else _mxu_kernel

    cost = pl.CostEstimate(
        flops=2 * B * H * C * L,
        transcendentals=0,
        bytes_accessed=(x.size * x.dtype.itemsize
                        + weight.size * weight.dtype.itemsize
                        + bias.size * bias.dtype.itemsize
                        + B * H * L * x.dtype.itemsize),
    )

    # NOTE: the trailing partial L block (L % TL != 0) relies on Pallas
    # discarding padded output columns; that is safe here only because the op
    # is pointwise along L (no reduction over L).
    return pl.pallas_call(
        kernel,
        out_shape=jax.ShapeDtypeStruct((B, H, L), x.dtype),
        grid_spec=pltpu.PrefetchScalarGridSpec(
            num_scalar_prefetch=0,
            grid=(B // TB, _cdiv(L, TL)),
            in_specs=[
                pl.BlockSpec((TB, C, TL), lambda bi, li: (bi, 0, li)),  # x tile
                pl.BlockSpec((H, C), lambda bi, li: (0, 0)),            # weight (VMEM-resident)
                pl.BlockSpec((H, 1), lambda bi, li: (0, 0)),            # bias   (VMEM-resident)
            ],
            out_specs=pl.BlockSpec((TB, H, TL), lambda bi, li: (bi, 0, li)),
        ),
        compiler_params=pltpu.CompilerParams(
            dimension_semantics=("parallel", "parallel"),
            vmem_limit_bytes=vmem_limit,
        ),
        cost_estimate=cost,
    )(x, weight, bias2d)


if __name__ == "__main__":
    # Shapes implied by Encoder(input_size, hidden_size) applied to (B, C, L).
    B, C, L, H = 2, 4, 16, 32

    key = jax.random.PRNGKey(0)
    kx, kw, kb = jax.random.split(key, 3)

    x = jax.random.normal(kx, (B, C, L), dtype=jnp.float32)
    # Conv1d weight is (H, C, 1) in torch; kernel_size=1 so we keep it as (H, C).
    weight = jax.random.normal(kw, (H, C), dtype=jnp.float32) * 0.1
    bias = jax.random.normal(kb, (H,), dtype=jnp.float32) * 0.1

    out = jax.block_until_ready(encoder_forward(x, weight, bias))
    ref = (jnp.einsum("hc,bcl->bhl", weight, x,
                      precision=jax.lax.Precision.HIGHEST)
           + bias[None, :, None])
    assert out.shape == (B, H, L)
    assert jnp.allclose(out, ref, atol=1e-5, rtol=1e-5)

    # Exercise the MXU path (C > 8) with L split across >= 2 grid steps.
    B2, C2, L2, H2 = 1, 16, 1024, 128
    x2 = jax.random.normal(kx, (B2, C2, L2), dtype=jnp.float32)
    w2 = jax.random.normal(kw, (H2, C2), dtype=jnp.float32) * 0.1
    b2 = jax.random.normal(kb, (H2,), dtype=jnp.float32) * 0.1
    out2 = jax.block_until_ready(encoder_forward(x2, w2, b2))
    ref2 = (jnp.einsum("hc,bcl->bhl", w2, x2,
                       precision=jax.lax.Precision.HIGHEST)
            + b2[None, :, None])
    assert jnp.allclose(out2, ref2, atol=1e-3, rtol=1e-3)

    print("KERNEL_OK")
</pallas_src>

<mosaic_0001>
module attributes {stable_mosaic.version = 11 : i64} {
  func.func @kernel(%arg0: i32, %arg1: i32, %arg2: memref<2x4x16xf32, #tpu.memory_space<vmem>>, %arg3: memref<32x4xf32, #tpu.memory_space<vmem>>, %arg4: memref<32x1xf32, #tpu.memory_space<vmem>>, %arg5: memref<2x32x16xf32, #tpu.memory_space<vmem>>) attributes {dimension_semantics = [#tpu.dimension_semantics<parallel>, #tpu.dimension_semantics<parallel>], iteration_bounds = array<i64: 1, 1>, scalar_prefetch = 0 : i64, scratch_operands = 0 : i64, tpu.core_type = #tpu.core_type<tc>, window_params = [{transform_indices = @transform_0, window_bounds = array<i64: 2, 4, 16>}, {pipeline_mode = #tpu.pipeline_mode<synchronous>, transform_indices = @transform_1, window_bounds = array<i64: 32, 4>}, {pipeline_mode = #tpu.pipeline_mode<synchronous>, transform_indices = @transform_2, window_bounds = array<i64: 32, 1>}, {transform_indices = @transform_3, window_bounds = array<i64: 2, 32, 16>}]} {
    %c0 = arith.constant 0 : index
    %c0_0 = arith.constant 0 : index
    %0 = vector.load %arg3[%c0, %c0_0] : memref<32x4xf32, #tpu.memory_space<vmem>>, vector<32x4xf32>
    %1 = vector.extract_strided_slice %0 {offsets = [0, 0], sizes = [32, 1], strides = [1, 1]} : vector<32x4xf32> to vector<32x1xf32>
    %2 = vector.extract_strided_slice %0 {offsets = [0, 1], sizes = [32, 1], strides = [1, 1]} : vector<32x4xf32> to vector<32x1xf32>
    %3 = vector.extract_strided_slice %0 {offsets = [0, 2], sizes = [32, 1], strides = [1, 1]} : vector<32x4xf32> to vector<32x1xf32>
    %4 = vector.extract_strided_slice %0 {offsets = [0, 3], sizes = [32, 1], strides = [1, 1]} : vector<32x4xf32> to vector<32x1xf32>
    %c0_1 = arith.constant 0 : index
    %c0_2 = arith.constant 0 : index
    %5 = vector.load %arg4[%c0_1, %c0_2] : memref<32x1xf32, #tpu.memory_space<vmem>>, vector<32x1xf32>
    %6 = vector.shape_cast %5 : vector<32x1xf32> to vector<32x1xf32>
    %7 = vector.broadcast %6 : vector<32x1xf32> to vector<32x16xf32>
    %c0_3 = arith.constant 0 : index
    %c0_4 = arith.constant 0 : index
    %c0_5 = arith.constant 0 : index
    %8 = vector.load %arg2[%c0_3, %c0_4, %c0_5] : memref<2x4x16xf32, #tpu.memory_space<vmem>>, vector<1x4x16xf32>
    %9 = vector.shape_cast %8 : vector<1x4x16xf32> to vector<4x16xf32>
    %10 = vector.extract_strided_slice %9 {offsets = [0, 0], sizes = [1, 16], strides = [1, 1]} : vector<4x16xf32> to vector<1x16xf32>
    %11 = vector.broadcast %1 : vector<32x1xf32> to vector<32x16xf32>
    %12 = vector.broadcast %10 : vector<1x16xf32> to vector<32x16xf32>
    %13 = arith.mulf %11, %12 : vector<32x16xf32>
    %14 = arith.addf %7, %13 : vector<32x16xf32>
    %15 = vector.extract_strided_slice %9 {offsets = [1, 0], sizes = [1, 16], strides = [1, 1]} : vector<4x16xf32> to vector<1x16xf32>
    %16 = vector.broadcast %2 : vector<32x1xf32> to vector<32x16xf32>
    %17 = vector.broadcast %15 : vector<1x16xf32> to vector<32x16xf32>
    %18 = arith.mulf %16, %17 : vector<32x16xf32>
    %19 = arith.addf %14, %18 : vector<32x16xf32>
    %20 = vector.extract_strided_slice %9 {offsets = [2, 0], sizes = [1, 16], strides = [1, 1]} : vector<4x16xf32> to vector<1x16xf32>
    %21 = vector.broadcast %3 : vector<32x1xf32> to vector<32x16xf32>
    %22 = vector.broadcast %20 : vector<1x16xf32> to vector<32x16xf32>
    %23 = arith.mulf %21, %22 : vector<32x16xf32>
    %24 = arith.addf %19, %23 : vector<32x16xf32>
    %25 = vector.extract_strided_slice %9 {offsets = [3, 0], sizes = [1, 16], strides = [1, 1]} : vector<4x16xf32> to vector<1x16xf32>
    %26 = vector.broadcast %4 : vector<32x1xf32> to vector<32x16xf32>
    %27 = vector.broadcast %25 : vector<1x16xf32> to vector<32x16xf32>
    %28 = arith.mulf %26, %27 : vector<32x16xf32>
    %29 = arith.addf %24, %28 : vector<32x16xf32>
    %c0_6 = arith.constant 0 : index
    %c0_7 = arith.constant 0 : index
    %c0_8 = arith.constant 0 : index
    %30 = vector.load %arg5[%c0_6, %c0_7, %c0_8] : memref<2x32x16xf32, #tpu.memory_space<vmem>>, vector<1x32x16xf32>
    %31 = vector.shape_cast %30 : vector<1x32x16xf32> to vector<32x16xf32>
    %32 = vector.shape_cast %29 : vector<32x16xf32> to vector<1x32x16xf32>
    tpu.vector_store %arg5[%c0_6, %c0_7, %c0_8], %32 {strides = array<i32>} : memref<2x32x16xf32, #tpu.memory_space<vmem>>, vector<1x32x16xf32>,
    %c1 = arith.constant 1 : index
    %c0_9 = arith.constant 0 : index
    %c0_10 = arith.constant 0 : index
    %33 = vector.load %arg2[%c1, %c0_9, %c0_10] : memref<2x4x16xf32, #tpu.memory_space<vmem>>, vector<1x4x16xf32>
    %34 = vector.shape_cast %33 : vector<1x4x16xf32> to vector<4x16xf32>
    %35 = vector.extract_strided_slice %34 {offsets = [0, 0], sizes = [1, 16], strides = [1, 1]} : vector<4x16xf32> to vector<1x16xf32>
    %36 = vector.broadcast %1 : vector<32x1xf32> to vector<32x16xf32>
    %37 = vector.broadcast %35 : vector<1x16xf32> to vector<32x16xf32>
    %38 = arith.mulf %36, %37 : vector<32x16xf32>
    %39 = arith.addf %7, %38 : vector<32x16xf32>
    %40 = vector.extract_strided_slice %34 {offsets = [1, 0], sizes = [1, 16], strides = [1, 1]} : vector<4x16xf32> to vector<1x16xf32>
    %41 = vector.broadcast %2 : vector<32x1xf32> to vector<32x16xf32>
    %42 = vector.broadcast %40 : vector<1x16xf32> to vector<32x16xf32>
    %43 = arith.mulf %41, %42 : vector<32x16xf32>
    %44 = arith.addf %39, %43 : vector<32x16xf32>
    %45 = vector.extract_strided_slice %34 {offsets = [2, 0], sizes = [1, 16], strides = [1, 1]} : vector<4x16xf32> to vector<1x16xf32>
    %46 = vector.broadcast %3 : vector<32x1xf32> to vector<32x16xf32>
    %47 = vector.broadcast %45 : vector<1x16xf32> to vector<32x16xf32>
    %48 = arith.mulf %46, %47 : vector<32x16xf32>
    %49 = arith.addf %44, %48 : vector<32x16xf32>
    %50 = vector.extract_strided_slice %34 {offsets = [3, 0], sizes = [1, 16], strides = [1, 1]} : vector<4x16xf32> to vector<1x16xf32>
    %51 = vector.broadcast %4 : vector<32x1xf32> to vector<32x16xf32>
    %52 = vector.broadcast %50 : vector<1x16xf32> to vector<32x16xf32>
    %53 = arith.mulf %51, %52 : vector<32x16xf32>
    %54 = arith.addf %49, %53 : vector<32x16xf32>
    %c1_11 = arith.constant 1 : index
    %c0_12 = arith.constant 0 : index
    %c0_13 = arith.constant 0 : index
    %55 = vector.load %arg5[%c1_11, %c0_12, %c0_13] : memref<2x32x16xf32, #tpu.memory_space<vmem>>, vector<1x32x16xf32>
    %56 = vector.shape_cast %55 : vector<1x32x16xf32> to vector<32x16xf32>
    %57 = vector.shape_cast %54 : vector<32x16xf32> to vector<1x32x16xf32>
    tpu.vector_store %arg5[%c1_11, %c0_12, %c0_13], %57 {strides = array<i32>} : memref<2x32x16xf32, #tpu.memory_space<vmem>>, vector<1x32x16xf32>,
    return
  }
  func.func @transform_0(%arg0: i32, %arg1: i32) -> (i32, i32, i32) {
    %c0_i32 = arith.constant 0 : i32
    %c0_i32_0 = arith.constant 0 : i32
    return %arg0, %c0_i32, %arg1 : i32, i32, i32
  }
  func.func @transform_1(%arg0: i32, %arg1: i32) -> (i32, i32) {
    %c0_i32 = arith.constant 0 : i32
    %c0_i32_0 = arith.constant 0 : i32
    %c0_i32_1 = arith.constant 0 : i32
    return %c0_i32, %c0_i32_0 : i32, i32
  }
  func.func @transform_2(%arg0: i32, %arg1: i32) -> (i32, i32) {
    %c0_i32 = arith.constant 0 : i32
    %c0_i32_0 = arith.constant 0 : i32
    %c0_i32_1 = arith.constant 0 : i32
    return %c0_i32, %c0_i32_0 : i32, i32
  }
  func.func @transform_3(%arg0: i32, %arg1: i32) -> (i32, i32, i32) {
    %c0_i32 = arith.constant 0 : i32
    %c0_i32_0 = arith.constant 0 : i32
    return %arg0, %c0_i32, %arg1 : i32, i32, i32
  }
}

</mosaic_0001>

<bundles_post_ra>
// kernel: tpu_custom_call.1
= control target key start
LH: loop header
LB: loop body
LE: loop exit
PB: predicated region body
PF: predicated region fallthrough
CT: control target
= control target key end

     0   :  { %v240_v0 = vmov 0   ;;  %v241_v9 = vmov 1   ;;  %v242_v10 = vmov 2   ;;  %v243_v11 = vmov 3   ;;  %s362_s2 = inlined_call_operand.vmem [shape: f32[32,1], index: 2, kind: input, shape index: {}]   ;;  %s363_s1 = inlined_call_operand.vmem [shape: f32[32,4], index: 1, kind: input, shape index: {}]   ;;  %s364_s0 = inlined_call_operand.vmem [shape: f32[2,4,16], index: 0, kind: input, shape index: {}]   ;;  %s365_s3 = inlined_call_operand.vmem [shape: f32[2,32,16], index: 3, kind: output, shape index: {}]  }
   0x1   :  { %233 = vset.pattern.permute.xlu1 %v240_v0  ;;  %232 = vset.pattern.permute.xlu0 %v240_v0  ;;  %v18_v1 = vld [vmem:[%s362_s2] sm:$0xff]  ;;  %v19_v3 = vld [vmem:[%s362_s2 + $0x8] sm:$0xff]  ;;  %v16_v5 = vld [vmem:[%s363_s1 + $0x10] sm:$0xff]  ;;  %v63_v16 = vlaneseq  ;;  %vm159_vm0 = vcmask 130048  }
   0x2   :  { %v14_v2 = vld [vmem:[%s363_s1] sm:$0xff]  ;;  %24 = vperm.xlu0 %232, %v18_v1   ;;  %v15_v4 = vld [vmem:[%s363_s1 + $0x8] sm:$0xff]  ;;  %v17_v6 = vld [vmem:[%s363_s1 + $0x18] sm:$0xff] }
   0x3   :  { %45 = vperm.xlu1 %233, %v14_v2   ;;  %v20_v7 = vld [vmem:[%s362_s2 + $0x10] sm:$0xff]  ;;  %v21_v8 = vld [vmem:[%s362_s2 + $0x18] sm:$0xff]  ;;  %v64_v19 = vshrl.u32 %v63_v16, 7  ;;  %v42_v23 = vld [vmem:[%s364_s0] sm:$0xf] }
   0x4   :  { %v223_v24 = vld [vmem:[%s364_s0 + $0x4] sm:$0xf] }
   0x5   :  { %v65_v22 = vsub.s32 0, %v64_v19  ;;  %v93_v27 = vsub.s32 1, %v64_v19  ;;  %v121_v30 = vsub.s32 2, %v64_v19  ;;  %v149_v35 = vsub.s32 3, %v64_v19 }
   0x6   :  { %29 = vperm.xlu0 %232, %v19_v3  }
   0x7   :  { %50 = vperm.xlu1 %233, %v15_v4   ;;  %v66_v28 = vrot.slane %v42_v23, %v65_v22  ;;  %v169_v29 = vrot.slane %v223_v24, %v65_v22  ;;  %v94_v33 = vrot.slane %v42_v23, %v93_v27  ;;  %v181_v34 = vrot.slane %v223_v24, %v93_v27 }
   0x8   :  { %v300_v38 = vrot.slane %v42_v23, %v121_v30  ;;  %v302_v39 = vrot.slane %v223_v24, %v121_v30  ;;  %v304_v44 = vrot.slane %v42_v23, %v149_v35  ;;  %v306_v45 = vrot.slane %v223_v24, %v149_v35 }
   0xa   :  { %55 = vperm.xlu0 %232, %v16_v5  }
   0xb   :  { %60 = vperm.xlu1 %233, %v17_v6  }
   0xe   :  { %34 = vperm.xlu0 %232, %v20_v7  }
   0xf   :  { %39 = vperm.xlu1 %233, %v21_v8  }
  0x12   :  { %234 = vset.pattern.permute.xlu0 %v241_v9 }
  0x13   :  { %235 = vset.pattern.permute.xlu1 %v241_v9  ;;  %76 = vperm.xlu0 %234, %v14_v2  }
  0x14   :  { %80 = vperm.xlu1 %235, %v15_v4  }
  0x17   :  { %88 = vperm.xlu0 %234, %v17_v6  }
  0x18   :  { %84 = vperm.xlu1 %235, %v16_v5  }
  0x1b   :  { %237 = vset.pattern.permute.xlu0 %v242_v10 }
  0x1c   :  { %236 = vset.pattern.permute.xlu1 %v242_v10  ;;  %108 = vperm.xlu0 %237, %v15_v4  }
  0x1d   :  { %104 = vperm.xlu1 %236, %v14_v2  }
  0x20   :  { %238 = vset.pattern.permute.xlu0 %v243_v11 }
  0x21   :  { %112 = vperm.xlu1 %236, %v16_v5   ;;  %132 = vperm.xlu0 %238, %v14_v2  }
  0x25   :  { %116 = vperm.xlu1 %236, %v17_v6   ;;  %144 = vperm.xlu0 %238, %v17_v6  }
  0x29   :  { %239 = vset.pattern.permute.xlu1 %v243_v11 }
  0x2a   :  { %136 = vperm.xlu1 %239, %v15_v4  }
  0x2e   :  { %140 = vperm.xlu1 %239, %v16_v5  }
  0x81   :  { %v25_v12 = vpop.permute.xlu0 %24 }
  0x82   :  { %v46_v13 = vpop.permute.xlu1 %45 }
  0x83   :  { %v67_v36 = vmul.f32 %v66_v28, %v46_v13  ;;  %v170_v37 = vmul.f32 %v169_v29, %v46_v13 }
  0x85   :  { %v30_v14 = vpop.permute.xlu0 %29  ;;  %v71_v46 = vadd.f32 %v67_v36, %v25_v12  ;;  %v174_v47 = vadd.f32 %v170_v37, %v25_v12 }
  0x86   :  { %v51_v15 = vpop.permute.xlu1 %50 }
  0x87   :  { %v68_v50 = vmul.f32 %v66_v28, %v51_v15  ;;  %v171_v51 = vmul.f32 %v169_v29, %v51_v15 }
  0x89   :  { %v288_v17 = vpop.permute.xlu0 %55  ;;  %v72_v2 = vadd.f32 %v68_v50, %v30_v14  ;;  %v175_v3 = vadd.f32 %v171_v51, %v30_v14 }
  0x8a   :  { %v61_v18 = vpop.permute.xlu1 %60  ;;  %v172_v14 = vmul.f32 %v169_v29, %v288_v17 }
  0x8b   :  { %v70_v52 = vmul.f32 %v66_v28, %v61_v18  ;;  %v173_v53 = vmul.f32 %v169_v29, %v61_v18  ;;  %v69_v18 = vmul.f32 %v66_v28, %v288_v17 }
  0x8d   :  { %v290_v20 = vpop.permute.xlu0 %34 }
  0x8e   :  { %v40_v21 = vpop.permute.xlu1 %39  ;;  %v73_v17 = vadd.f32 %v69_v18, %v290_v20 }
  0x8f   :  { %v74_v59 = vadd.f32 %v70_v52, %v40_v21  ;;  %v177_v60 = vadd.f32 %v173_v53, %v40_v21 }
  0x92   :  { %v77_v25 = vpop.permute.xlu0 %76 }
  0x93   :  { %v81_v26 = vpop.permute.xlu1 %80  ;;  %v95_v40 = vmul.f32 %v94_v33, %v77_v25  ;;  %v182_v41 = vmul.f32 %v181_v34, %v77_v25 }
  0x94   :  { %v96_v4 = vmul.f32 %v94_v33, %v81_v26  ;;  %v183_v5 = vmul.f32 %v181_v34, %v81_v26  ;;  %v176_v26 = vadd.f32 %v172_v14, %v290_v20 }
  0x95   :  { %v99_v54 = vadd.f32 %v95_v40, %v71_v46  ;;  %v186_v55 = vadd.f32 %v182_v41, %v174_v47 }
  0x96   :  { %v89_v31 = vpop.permute.xlu0 %88  ;;  %v100_v22 = vadd.f32 %v96_v4, %v72_v2  ;;  %v187_v23 = vadd.f32 %v183_v5, %v175_v3 }
  0x97   :  { %v298_v32 = vpop.permute.xlu1 %84  ;;  %v98_v56 = vmul.f32 %v94_v33, %v89_v31  ;;  %v185_v57 = vmul.f32 %v181_v34, %v89_v31 }
  0x98   :  { %v97_v27 = vmul.f32 %v94_v33, %v298_v32  ;;  %v184_v28 = vmul.f32 %v181_v34, %v298_v32 }
  0x99   :  { %v102_v6 = vadd.f32 %v98_v56, %v74_v59  ;;  %v189_v7 = vadd.f32 %v185_v57, %v177_v60 }
  0x9a   :  { %v101_v20 = vadd.f32 %v97_v27, %v73_v17  ;;  %v188_v32 = vadd.f32 %v184_v28, %v176_v26 }
  0x9b   :  { %v109_v42 = vpop.permute.xlu0 %108 }
  0x9c   :  { %v105_v43 = vpop.permute.xlu1 %104  ;;  %v124_v11 = vmul.f32 %v300_v38, %v109_v42  ;;  %v195_v12 = vmul.f32 %v302_v39, %v109_v42 }
  0x9d   :  { %v123_v48 = vmul.f32 %v300_v38, %v105_v43  ;;  %v194_v49 = vmul.f32 %v302_v39, %v105_v43 }
  0x9e   :  { %v128_v29 = vadd.f32 %v124_v11, %v100_v22  ;;  %v199_v30 = vadd.f32 %v195_v12, %v187_v23 }
  0x9f   :  { %v127_v62 = vadd.f32 %v123_v48, %v99_v54  ;;  %v198_v63 = vadd.f32 %v194_v49, %v186_v55 }
  0xa0   :  { %v113_v58 = vpop.permute.xlu1 %112  ;;  %v133_v61 = vpop.permute.xlu0 %132 }
  0xa1   :  { %v151_v0 = vmul.f32 %v304_v44, %v133_v61  ;;  %v206_v1 = vmul.f32 %v306_v45, %v133_v61  ;;  %v125_v37 = vmul.f32 %v300_v38, %v113_v58  ;;  %v196_v40 = vmul.f32 %v302_v39, %v113_v58 }
  0xa3   :  { %v155_v8 = vadd.f32 %v151_v0, %v127_v62  ;;  %v210_v9 = vadd.f32 %v206_v1, %v198_v63  ;;  %v200_v43 = vadd.f32 %v196_v40, %v188_v32 }
  0xa4   :  { %v117_v10 = vpop.permute.xlu1 %116  ;;  %v145_v16 = vpop.permute.xlu0 %144 }
  0xa5   :  { %v126_v13 = vmul.f32 %v300_v38, %v117_v10  ;;  %v197_v15 = vmul.f32 %v302_v39, %v117_v10  ;;  %160 = vst.msk [vmem:[%s365_s3] sm:$0xff] %vm159_vm0, %v155_v8  ;;  %224 = vst.msk [vmem:[%s365_s3 + $0x20] sm:$0xff] %vm159_vm0, %v210_v9  ;;  %v154_v19 = vmul.f32 %v304_v44, %v145_v16 }
  0xa6   :  { %v209_v21 = vmul.f32 %v306_v45, %v145_v16  ;;  %v129_v39 = vadd.f32 %v125_v37, %v101_v20 }
  0xa7   :  { %v130_v24 = vadd.f32 %v126_v13, %v102_v6  ;;  %v201_v25 = vadd.f32 %v197_v15, %v189_v7 }
  0xa9   :  { %v158_v31 = vadd.f32 %v154_v19, %v130_v24  ;;  %v213_v35 = vadd.f32 %v209_v21, %v201_v25  ;;  %v137_v36 = vpop.permute.xlu1 %136 }
  0xaa   :  { %v152_v41 = vmul.f32 %v304_v44, %v137_v36  ;;  %v207_v42 = vmul.f32 %v306_v45, %v137_v36 }
  0xab   :  { %163 = vst.msk [vmem:[%s365_s3 + $0x18] sm:$0xff] %vm159_vm0, %v158_v31  ;;  %227 = vst.msk [vmem:[%s365_s3 + $0x38] sm:$0xff] %vm159_vm0, %v213_v35 }
  0xac   :  { %v156_v33 = vadd.f32 %v152_v41, %v128_v29  ;;  %v211_v34 = vadd.f32 %v207_v42, %v199_v30 }
  0xad   :  { %v141_v38 = vpop.permute.xlu1 %140 }
  0xae   :  { %161 = vst.msk [vmem:[%s365_s3 + $0x8] sm:$0xff] %vm159_vm0, %v156_v33  ;;  %225 = vst.msk [vmem:[%s365_s3 + $0x28] sm:$0xff] %vm159_vm0, %v211_v34  ;;  %v153_v46 = vmul.f32 %v304_v44, %v141_v38  ;;  %v208_v47 = vmul.f32 %v306_v45, %v141_v38 }
  0xb0   :  { %v157_v48 = vadd.f32 %v153_v46, %v129_v39  ;;  %v212_v49 = vadd.f32 %v208_v47, %v200_v43 }
  0xb2   :  { %162 = vst.msk [vmem:[%s365_s3 + $0x10] sm:$0xff] %vm159_vm0, %v157_v48  ;;  %226 = vst.msk [vmem:[%s365_s3 + $0x30] sm:$0xff] %vm159_vm0, %v212_v49 }

</bundles_post_ra>
